<compile_context>
chip_gen: v7x
topology: tpu7x:2x2x1
jax: 0.10.0
libtpu: 0.0.40
codegen_flags: <defaults>
</compile_context>

<pallas_src>
import functools

import jax
import jax.numpy as jnp
from jax.experimental import pallas as pl
from jax.experimental.pallas import tpu as pltpu


def _round_up(x, m):
    return ((x + m - 1) // m) * m


# ---------------------------------------------------------------------------
# Pass 1: streaming per-channel sum.
#   grid = (N, C-blocks, HW-chunks); HW axis is the reduction axis (innermost,
#   "arbitrary").  A (tile_c, 128) f32 scratch is the running accumulator; the
#   (1, tile_c, 1) output block is written once at the last HW step.
# ---------------------------------------------------------------------------
def _pool_sum_kernel(x_ref, sum_ref, acc_ref, *, hw, tile_hw):
    # x_ref:   (1, tile_c, tile_hw) input chunk (may be OOB-padded on the tail)
    # sum_ref: (1, tile_c, 1)       per-channel sums (written at last HW step)
    # acc_ref: (tile_c, 128)        lane-wide f32 running accumulator (scratch)
    h = pl.program_id(2)
    n_hw = (hw + tile_hw - 1) // tile_hw        # static
    rem = hw - (n_hw - 1) * tile_hw             # static: valid lanes in tail chunk
    n_grp = tile_hw // 128
    tile_c = acc_ref.shape[0]

    @pl.when(h == 0)
    def _():
        acc_ref[...] = jnp.zeros_like(acc_ref)

    def accumulate(limit):
        # Fold the lane groups of this chunk into 128 lanes with plain VALU
        # adds; `limit` (static) masks the ragged tail chunk only where needed.
        partial = jnp.zeros((tile_c, 128), jnp.float32)
        for i in range(n_grp):
            if i * 128 >= limit:
                break                            # statically out of range
            chunk = x_ref[0, :, i * 128:(i + 1) * 128].astype(jnp.float32)
            if (i + 1) * 128 > limit:            # group straddles the boundary
                lane = jax.lax.broadcasted_iota(jnp.int32, (tile_c, 128), 1)
                chunk = jnp.where(lane < (limit - i * 128), chunk, 0.0)
            partial = partial + chunk
        acc_ref[...] += partial

    if n_hw > 1:
        @pl.when(h < n_hw - 1)
        def _():
            accumulate(tile_hw)                  # full chunk: no masking

    @pl.when(h == n_hw - 1)
    def _():
        accumulate(rem)                          # tail chunk (rem may == tile_hw)
        sum_ref[0] = jnp.sum(acc_ref[...], axis=1, keepdims=True)


# ---------------------------------------------------------------------------
# Pass 2: fused (1x1 conv + BN + ReLU) + broadcast-write.
#   Both grid axes are "parallel".  The matvec is tiny and recomputed per
#   block (hidden under the store DMA); output tiles are lane-dense multiples
#   of 128 -> unmasked stores except the Pallas-masked tail block.
# ---------------------------------------------------------------------------
def _fused_broadcast_kernel(pooled_ref, w_ref, b_ref, o_ref):
    # pooled_ref: (1, C_in, 1)  per-channel sums for this batch element (f32)
    # w_ref:      (C_out, C_in) conv weight with BN scale and 1/HW folded in
    # b_ref:      (C_out, 1)    folded BN shift
    # o_ref:      (1, C_out, T) output chunk
    y = jnp.dot(w_ref[...], pooled_ref[0],
                preferred_element_type=jnp.float32)          # (C_out, 1)
    y = jnp.maximum(y + b_ref[...], 0.0)                      # BN shift + ReLU
    o_ref[0] = jnp.broadcast_to(y, o_ref.shape[1:]).astype(o_ref.dtype)


@functools.partial(jax.jit, static_argnames=("eps",))
def aspp_pooling(x, w, bn_gamma, bn_beta, bn_mean, bn_var, eps=1e-5):
    """x: (N, C_in, H, W), w: (C_out, C_in) 1x1 conv weight -> (N, C_out, H, W)."""
    N, C_in, H, W = x.shape
    C_out = w.shape[0]
    HW = H * W
    itemsize = jnp.dtype(x.dtype).itemsize

    BUDGET = 8 * 1024 * 1024          # per-buffer bytes for the streaming passes
    VMEM_LIMIT = 32 * 1024 * 1024     # safe on v5e/v6e (128 MiB) and v7x (64 MiB)
    hw_ceil = _round_up(HW, 128)

    # Channel blocking for pass 1 (gives megacore a parallel axis when N small).
    tile_c = C_in if C_in <= 512 else 256
    n_c = pl.cdiv(C_in, tile_c)

    # Pass-1 HW tile: budget / channel-block, multiple of 128, capped to bound
    # the in-kernel lane-group unroll.
    t1 = max(128, (BUDGET // (itemsize * tile_c)) // 128 * 128)
    t1 = min(t1, hw_ceil, 64 * 128)
    n_hw1 = pl.cdiv(HW, t1)

    x_flat = x.reshape(N, C_in, HW)   # free view of contiguous NCHW

    # -------------------- Pass 1: global-avg-pool (as a sum) -----------------
    pooled_sum = pl.pallas_call(
        functools.partial(_pool_sum_kernel, hw=HW, tile_hw=t1),
        out_shape=jax.ShapeDtypeStruct((N, C_in, 1), jnp.float32),
        grid_spec=pltpu.PrefetchScalarGridSpec(
            num_scalar_prefetch=0,
            grid=(N, n_c, n_hw1),
            in_specs=[pl.BlockSpec((1, tile_c, t1), lambda n, c, h: (n, c, h))],
            out_specs=pl.BlockSpec((1, tile_c, 1), lambda n, c, h: (n, c, 0)),
            scratch_shapes=[pltpu.VMEM((tile_c, 128), jnp.float32)],
        ),
        compiler_params=pltpu.CompilerParams(
            dimension_semantics=("parallel", "parallel", "arbitrary"),
            vmem_limit_bytes=VMEM_LIMIT),
    )(x_flat)                                                  # (N, C_in, 1)

    # Fold BN scale and the 1/HW mean divisor into the 1x1 conv weight (tiny).
    scale = (bn_gamma / jnp.sqrt(bn_var + eps)).astype(jnp.float32)      # (C_out,)
    w_eff = (w.astype(jnp.float32) * scale[:, None]) / jnp.float32(HW)   # (C_out, C_in)
    shift = (bn_beta - bn_mean * scale).astype(jnp.float32).reshape(C_out, 1)

    # Pass-2 HW tile: budget / C_out.
    t2 = max(128, (BUDGET // (itemsize * C_out)) // 128 * 128)
    t2 = min(t2, hw_ceil)
    n_hw2 = pl.cdiv(HW, t2)

    # -------------- Pass 2: conv+BN+ReLU + broadcast "bilinear upsample" -----
    out_flat = pl.pallas_call(
        _fused_broadcast_kernel,
        out_shape=jax.ShapeDtypeStruct((N, C_out, HW), x.dtype),
        grid_spec=pltpu.PrefetchScalarGridSpec(
            num_scalar_prefetch=0,
            grid=(N, n_hw2),
            in_specs=[pl.BlockSpec((1, C_in, 1), lambda n, h: (n, 0, 0)),
                      pl.BlockSpec((C_out, C_in), lambda n, h: (0, 0)),
                      pl.BlockSpec((C_out, 1), lambda n, h: (0, 0))],
            out_specs=pl.BlockSpec((1, C_out, t2), lambda n, h: (n, 0, h)),
        ),
        compiler_params=pltpu.CompilerParams(
            dimension_semantics=("parallel", "parallel"),
            vmem_limit_bytes=VMEM_LIMIT),
    )(pooled_sum, w_eff, shift)

    return out_flat.reshape(N, C_out, H, W)   # contiguous -> free reshape


if __name__ == "__main__":
    # Small shapes consistent with the module's forward.
    N, C_in, H, W = 2, 4, 16, 16
    C_out = 8

    key = jax.random.PRNGKey(0)
    kx, kw, kg, kb, km, kv = jax.random.split(key, 6)

    x = jax.random.normal(kx, (N, C_in, H, W), dtype=jnp.float32)

    # Deterministic synthetic parameters (Conv2d(C_in, C_out, 1, bias=False) + BN eval).
    w = jax.random.normal(kw, (C_out, C_in), dtype=jnp.float32) * 0.1
    bn_gamma = 1.0 + 0.01 * jax.random.normal(kg, (C_out,), dtype=jnp.float32)
    bn_beta = 0.01 * jax.random.normal(kb, (C_out,), dtype=jnp.float32)
    bn_mean = 0.01 * jax.random.normal(km, (C_out,), dtype=jnp.float32)
    bn_var = jnp.abs(1.0 + 0.01 * jax.random.normal(kv, (C_out,), dtype=jnp.float32))

    out = aspp_pooling(x, w, bn_gamma, bn_beta, bn_mean, bn_var)
    jax.block_until_ready(out)

    # Pure-JAX reference of the same (eval-mode) semantics.
    pooled = jnp.mean(x, axis=(2, 3))                          # AdaptiveAvgPool2d(1)
    y_ref = pooled @ w.T                                       # 1x1 conv, no bias
    scale = bn_gamma / jnp.sqrt(bn_var + 1e-5)
    y_ref = y_ref * scale + (bn_beta - bn_mean * scale)        # BatchNorm (eval)
    y_ref = jnp.maximum(y_ref, 0.0)                            # ReLU
    ref = jnp.broadcast_to(y_ref[:, :, None, None], (N, C_out, H, W))  # bilinear up from 1x1
    assert jnp.allclose(out, ref, atol=1e-5, rtol=1e-5), "mismatch vs reference"

    print("KERNEL_OK")
</pallas_src>

<mosaic_0001>
module attributes {stable_mosaic.version = 11 : i64} {
  func.func @_fused_broadcast_kernel(%arg0: i32, %arg1: i32, %arg2: memref<1x4x1xf32, #tpu.memory_space<vmem>>, %arg3: memref<8x4xf32, #tpu.memory_space<vmem>>, %arg4: memref<8x1xf32, #tpu.memory_space<vmem>>, %arg5: memref<1x8x256xf32, #tpu.memory_space<vmem>>) attributes {dimension_semantics = [#tpu.dimension_semantics<parallel>, #tpu.dimension_semantics<parallel>], iteration_bounds = array<i64: 2, 1>, scalar_prefetch = 0 : i64, scratch_operands = 0 : i64, tpu.core_type = #tpu.core_type<tc>, window_params = [{transform_indices = @transform_0, window_bounds = array<i64: 1, 4, 1>}, {pipeline_mode = #tpu.pipeline_mode<synchronous>, transform_indices = @transform_1, window_bounds = array<i64: 8, 4>}, {pipeline_mode = #tpu.pipeline_mode<synchronous>, transform_indices = @transform_2, window_bounds = array<i64: 8, 1>}, {transform_indices = @transform_3, window_bounds = array<i64: 1, 8, 256>}]} {
    %c0 = arith.constant 0 : index
    %c0_0 = arith.constant 0 : index
    %0 = vector.load %arg3[%c0, %c0_0] : memref<8x4xf32, #tpu.memory_space<vmem>>, vector<8x4xf32>
    %c0_1 = arith.constant 0 : index
    %c0_2 = arith.constant 0 : index
    %c0_3 = arith.constant 0 : index
    %1 = vector.load %arg2[%c0_1, %c0_2, %c0_3] : memref<1x4x1xf32, #tpu.memory_space<vmem>>, vector<1x4x1xf32>
    %2 = vector.shape_cast %1 : vector<1x4x1xf32> to vector<4x1xf32>
    %cst = arith.constant dense<0.000000e+00> : vector<8x1xf32>
    %3 = tpu.matmul %0, %2, %cst {dimension_numbers = #tpu.dot_dimension_numbers<[1], [0], [0], [1], [0, 0, 1, 1], [], []>} : vector<8x4xf32>, vector<4x1xf32>, vector<8x1xf32> -> vector<8x1xf32>
    %c0_4 = arith.constant 0 : index
    %c0_5 = arith.constant 0 : index
    %4 = vector.load %arg4[%c0_4, %c0_5] : memref<8x1xf32, #tpu.memory_space<vmem>>, vector<8x1xf32>
    %5 = arith.addf %3, %4 : vector<8x1xf32>
    %cst_6 = arith.constant 0.000000e+00 : f32
    %6 = vector.broadcast %cst_6 : f32 to vector<8x1xf32>
    %7 = arith.maximumf %5, %6 : vector<8x1xf32>
    %8 = vector.shape_cast %7 : vector<8x1xf32> to vector<8x1xf32>
    %9 = vector.broadcast %8 : vector<8x1xf32> to vector<8x256xf32>
    %c0_7 = arith.constant 0 : index
    %c0_8 = arith.constant 0 : index
    %c0_9 = arith.constant 0 : index
    %10 = vector.load %arg5[%c0_7, %c0_8, %c0_9] : memref<1x8x256xf32, #tpu.memory_space<vmem>>, vector<1x8x256xf32>
    %11 = vector.shape_cast %10 : vector<1x8x256xf32> to vector<8x256xf32>
    %12 = vector.shape_cast %9 : vector<8x256xf32> to vector<1x8x256xf32>
    tpu.vector_store %arg5[%c0_7, %c0_8, %c0_9], %12 {strides = array<i32>} : memref<1x8x256xf32, #tpu.memory_space<vmem>>, vector<1x8x256xf32>,
    return
  }
  func.func @transform_0(%arg0: i32, %arg1: i32) -> (i32, i32, i32) {
    %c0_i32 = arith.constant 0 : i32
    %c0_i32_0 = arith.constant 0 : i32
    %c0_i32_1 = arith.constant 0 : i32
    return %arg0, %c0_i32, %c0_i32_0 : i32, i32, i32
  }
  func.func @transform_1(%arg0: i32, %arg1: i32) -> (i32, i32) {
    %c0_i32 = arith.constant 0 : i32
    %c0_i32_0 = arith.constant 0 : i32
    %c0_i32_1 = arith.constant 0 : i32
    return %c0_i32, %c0_i32_0 : i32, i32
  }
  func.func @transform_2(%arg0: i32, %arg1: i32) -> (i32, i32) {
    %c0_i32 = arith.constant 0 : i32
    %c0_i32_0 = arith.constant 0 : i32
    %c0_i32_1 = arith.constant 0 : i32
    return %c0_i32, %c0_i32_0 : i32, i32
  }
  func.func @transform_3(%arg0: i32, %arg1: i32) -> (i32, i32, i32) {
    %c0_i32 = arith.constant 0 : i32
    %c0_i32_0 = arith.constant 0 : i32
    return %arg0, %c0_i32, %arg1 : i32, i32, i32
  }
}

module attributes {stable_mosaic.version = 11 : i64} {
  func.func @_pool_sum_kernel(%arg0: i32, %arg1: i32, %arg2: i32, %arg3: memref<1x4x256xf32, #tpu.memory_space<vmem>>, %arg4: memref<1x4x1xf32, #tpu.memory_space<vmem>>, %arg5: memref<4x128xf32, #tpu.memory_space<vmem>>) attributes {dimension_semantics = [#tpu.dimension_semantics<parallel>, #tpu.dimension_semantics<parallel>, #tpu.dimension_semantics<arbitrary>], iteration_bounds = array<i64: 2, 1, 1>, scalar_prefetch = 0 : i64, scratch_operands = 1 : i64, tpu.core_type = #tpu.core_type<tc>, window_params = [{transform_indices = @transform_0, window_bounds = array<i64: 1, 4, 256>}, {transform_indices = @transform_1, window_bounds = array<i64: 1, 4, 1>}]} {
    %c0_i32 = arith.constant 0 : i32
    %0 = arith.cmpi eq, %arg2, %c0_i32 : i32
    %1 = arith.extui %0 : i1 to i32
    %c0_i32_0 = arith.constant 0 : i32
    %2 = arith.cmpi ne, %1, %c0_i32_0 : i32
    scf.if %2 {
      %cst = arith.constant 0.000000e+00 : f32
      %6 = vector.broadcast %cst : f32 to vector<4x128xf32>
      %c0 = arith.constant 0 : index
      %c0_3 = arith.constant 0 : index
      %7 = vector.load %arg5[%c0, %c0_3] : memref<4x128xf32, #tpu.memory_space<vmem>>, vector<4x128xf32>
      tpu.vector_store %arg5[%c0, %c0_3], %6 {strides = array<i32>} : memref<4x128xf32, #tpu.memory_space<vmem>>, vector<4x128xf32>,
    } else {
    }
    %c0_i32_1 = arith.constant 0 : i32
    %3 = arith.cmpi eq, %arg2, %c0_i32_1 : i32
    %4 = arith.extui %3 : i1 to i32
    %c0_i32_2 = arith.constant 0 : i32
    %5 = arith.cmpi ne, %4, %c0_i32_2 : i32
    scf.if %5 {
      %cst = arith.constant 0.000000e+00 : f32
      %6 = vector.broadcast %cst : f32 to vector<4x128xf32>
      %c0 = arith.constant 0 : index
      %c0_3 = arith.constant 0 : index
      %c0_4 = arith.constant 0 : index
      %7 = vector.load %arg3[%c0, %c0_3, %c0_4] : memref<1x4x256xf32, #tpu.memory_space<vmem>>, vector<1x4x128xf32>
      %8 = vector.shape_cast %7 : vector<1x4x128xf32> to vector<4x128xf32>
      %9 = arith.addf %6, %8 : vector<4x128xf32>
      %c0_5 = arith.constant 0 : index
      %c0_6 = arith.constant 0 : index
      %c128 = arith.constant 128 : index
      %10 = vector.load %arg3[%c0_5, %c0_6, %c128] : memref<1x4x256xf32, #tpu.memory_space<vmem>>, vector<1x4x128xf32>
      %11 = vector.shape_cast %10 : vector<1x4x128xf32> to vector<4x128xf32>
      %12 = arith.addf %9, %11 : vector<4x128xf32>
      %c0_7 = arith.constant 0 : index
      %c0_8 = arith.constant 0 : index
      %13 = vector.load %arg5[%c0_7, %c0_8] : memref<4x128xf32, #tpu.memory_space<vmem>>, vector<4x128xf32>
      %14 = arith.addf %13, %12 : vector<4x128xf32>
      %c0_9 = arith.constant 0 : index
      %c0_10 = arith.constant 0 : index
      %15 = vector.load %arg5[%c0_9, %c0_10] : memref<4x128xf32, #tpu.memory_space<vmem>>, vector<4x128xf32>
      tpu.vector_store %arg5[%c0_9, %c0_10], %14 {strides = array<i32>} : memref<4x128xf32, #tpu.memory_space<vmem>>, vector<4x128xf32>,
      %c0_11 = arith.constant 0 : index
      %c0_12 = arith.constant 0 : index
      %16 = vector.load %arg5[%c0_11, %c0_12] : memref<4x128xf32, #tpu.memory_space<vmem>>, vector<4x128xf32>
      %cst_13 = arith.constant dense<0.000000e+00> : vector<4xf32>
      %17 = vector.multi_reduction <add>, %16, %cst_13 [1] : vector<4x128xf32> to vector<4xf32>
      %18 = vector.shape_cast %17 : vector<4xf32> to vector<4x1xf32>
      %c0_14 = arith.constant 0 : index
      %c0_15 = arith.constant 0 : index
      %c0_16 = arith.constant 0 : index
      %19 = vector.load %arg4[%c0_14, %c0_15, %c0_16] : memref<1x4x1xf32, #tpu.memory_space<vmem>>, vector<1x4x1xf32>
      %20 = vector.shape_cast %19 : vector<1x4x1xf32> to vector<4x1xf32>
      %21 = vector.shape_cast %18 : vector<4x1xf32> to vector<1x4x1xf32>
      tpu.vector_store %arg4[%c0_14, %c0_15, %c0_16], %21 {strides = array<i32>} : memref<1x4x1xf32, #tpu.memory_space<vmem>>, vector<1x4x1xf32>,
    } else {
    }
    return
  }
  func.func @transform_0(%arg0: i32, %arg1: i32, %arg2: i32) -> (i32, i32, i32) {
    %c0_i32 = arith.constant 0 : i32
    return %arg0, %arg1, %arg2 : i32, i32, i32
  }
  func.func @transform_1(%arg0: i32, %arg1: i32, %arg2: i32) -> (i32, i32, i32) {
    %c0_i32 = arith.constant 0 : i32
    %c0_i32_0 = arith.constant 0 : i32
    return %arg0, %arg1, %c0_i32 : i32, i32, i32
  }
}

</mosaic_0001>

<bundles_post_ra>
// kernel: aspp_pooling.2
= control target key start
LH: loop header
LB: loop body
LE: loop exit
PB: predicated region body
PF: predicated region fallthrough
CT: control target
= control target key end

     0   :  { %s348_s6 = smov 0   ;;  %s350_s7 = smov 0   ;;  %s378_s0 = inlined_call_operand.vmem [shape: f32[2,4,256], index: 0, kind: input, shape index: {}]   ;;  %s379_s1 = inlined_call_operand.vmem [shape: f32[2,4,1], index: 1, kind: output, shape index: {}]  }
   0x1   :  { %s352_s8 = smov 0  }
   0x2 LB: > { %s30_s9 = sadd.s32 1, %s331_s7  ;;  %p281_p0 = scmp.ge.s32.totalorder %s335_s8, 1  ;;  %s335_s8 = sphi %s352_s8, %s11_s8   ;;  %s331_s7 = sphi %s350_s7, %s381_s7   ;;  %s327_s6 = sphi %s348_s6, %s380_s6  }
   0x3   : > { %p32_p1 = scmp.ge.s32.totalorder %s30_s9, 2  ;;  %p121_p2 = scmp.lt.s32.totalorder %s335_s8, 3 }
   0x5   : > { %s383_s9 = smov (%p32_p1, %s30_s9), 0  ;;  %p122_p3 = pnand %p281_p0, %p121_p2 }
   0x6   : > { %p152_p4 = scmp.lt.s32.totalorder (!%p122_p3), %s327_s6, 1  ;;  %v337_v0 = vmov (!%p122_p3), 0.0   ;;  %vm185_vm0 = vcmask (!%p122_p3), 1043456   ;;  %vm189_vm1 = vcmask (!%p122_p3), 3072  }
   0x7   : > { %125 = sbr.rel (%p122_p3) target bundleno = 174 (0xae), region = 24  ;;  %176 = vst [vmem:[#allocation2] sm:$0xf] (!%p122_p3), %v337_v0 }
   0xe   : > { %s385_s6 = smov (!%p152_p4, %s327_s6), 1  ;;  %v181_v4 = vld [vmem:[#allocation2] sm:$0xf] }
   0xf   : > { %s287_s10 = sshll.u32 %s385_s6, 3  ;;  %s284_s14 = sshll.u32 %s385_s6, 2 }
  0x10   : > { %s163_s13 = scalar_lea.vmem %s378_s0, %s287_s10  ;;  %s171_s17 = scalar_lea.vmem %s379_s1, %s284_s14 }
  0x11   : > { %v177_v1 = vld [vmem:[%s163_s13] sm:$0xf]  ;;  %v179_v2 = vld [vmem:[%s163_s13 + $0x4] sm:$0xf] }
  0x12   : > { %v180_v3 = vadd.f32 %v179_v2, %v177_v1 }
  0x14   : > { %v182_v5 = vadd.f32 %v181_v4, %v180_v3 }
  0x16   : > { %183 = vst [vmem:[#allocation2] sm:$0xf] %v182_v5 }
  0x1d   : > { %v184_v6 = vld [vmem:[#allocation2] sm:$0xf] }
  0x1e   : > { %v186_v7 = vsel %vm185_vm0, %v184_v6, 0.0 }
  0x1f   : > { %187 = vadd.xlane.f32.xlu0 %v186_v7 }
  0xac   : > { %v188_v8 = vpop.xlane.xlu0 %187 }
  0xad   : > { %190 = vst.msk [vmem:[%s171_s17] sm:$0xf] %vm189_vm1, %v188_v8 }
  0xae PF: > { %s11_s8 = sadd.s32 1, %s335_s8   ;;  %s380_s6 = smov %s331_s7 }
  0xaf   : > { %p8_p5 = scmp.ge.s32.totalorder %s11_s8, 4   ;;  %s381_s7 = smov %s383_s9 }
  0xb1   :  { %10 = sbr.rel (!%p8_p5) target bundleno = 2 (0x2), region = 58 }

// kernel: aspp_pooling.3
= control target key start
LH: loop header
LB: loop body
LE: loop exit
PB: predicated region body
PF: predicated region fallthrough
CT: control target
= control target key end

     0   :  { %s456_s12 = smov 0   ;;  %s458_s13 = smov 0   ;;  %s495_s0 = inlined_call_operand.vmem [shape: f32[2,4,1], index: 0, kind: input, shape index: {}]   ;;  %s496_s1 = inlined_call_operand.vmem [shape: f32[8,4], index: 1, kind: input, shape index: {}]   ;;  %s497_s2 = inlined_call_operand.vmem [shape: f32[8,1], index: 2, kind: input, shape index: {}]   ;;  %s498_s3 = inlined_call_operand.vmem [shape: f32[2,8,256], index: 3, kind: output, shape index: {}]  }
   0x1   :  { %s460_s14 = smov 0  }
   0x2 LB: > { %s25_s15 = sadd.s32 1, %s427_s13  ;;  %p365_p0 = scmp.ge.s32.totalorder %s431_s14, 1  ;;  %s431_s14 = sphi %s460_s14, %s13_s14   ;;  %s427_s13 = sphi %s458_s13, %s500_s13   ;;  %s423_s12 = sphi %s456_s12, %s499_s12  }
   0x3   : > { %p27_p1 = scmp.ge.s32.totalorder %s25_s15, 2  ;;  %p150_p2 = scmp.lt.s32.totalorder %s431_s14, 3 }
   0x5   : > { %s502_s15 = smov (%p27_p1, %s25_s15), 0  ;;  %p151_p3 = pnand %p365_p0, %p150_p2 }
   0x6   : > { %p177_p4 = scmp.lt.s32.totalorder (!%p151_p3), %s423_s12, 1  ;;  %v433_v0 = vmov (!%p151_p3), 0.0   ;;  %vm434_vm0 = vmmov (!%p151_p3), 0   ;;  %vm198_vm1 = vcmask (!%p151_p3), 1043456   ;;  %v191_v1 = vld [vmem:[%s496_s1] sm:$0xff] (!%p151_p3)  ;;  %vm194_vm2 = vcmask (!%p151_p3), 31744  }
   0x7   : > { %154 = sbr.rel (%p151_p3) target bundleno = 364 (0x16c), region = 32  ;;  %376 = vmatprep.subr.mxu0 (!%p151_p3), %v433_v0  ;;  %378 = vmatprep.mubr.msk.f32.mxu0 (!%p151_p3), %vm434_vm0, %v433_v0  ;;  %v435_v3 = vmov (!%p151_p3), 0   ;;  %v193_v4 = vld [vmem:[%s497_s2] sm:$0xff] (!%p151_p3) }
   0x8   : > { %408 = vset.pattern.permute.xlu0 (!%p151_p3), %v435_v3 }
   0xe   : > { %s504_s12 = smov (!%p177_p4, %s423_s12), 1 }
   0xf   : > { %s366_s16 = sshll.u32 %s504_s12, 2  ;;  %s373_s24 = sshll.u32 %s504_s12, 4 }
  0x10   : > { %s180_s19 = scalar_lea.vmem %s495_s0, %s366_s16  ;;  %s189_s27 = scalar_lea.vmem %s498_s3, %s373_s24 }
  0x11   : > { %v192_v2 = vld [vmem:[%s180_s19] sm:$0xf] }
  0x12   : > { %377 = vmatpush3.msk.msra.mxu0 %vm198_vm1, %v192_v2 }
  0x13   : > { %379 = vmatmul.mubr.msk.f32.vlgmr.msra.gmra.mrb[0].mxu0 %vm194_vm2, %v191_v1 }
  0xe6   : > { %v268_v5 = vpop.f32.mrb[0].mxu0 }
  0xe7   : > { %v269_v6 = vadd.f32 %v268_v5, %v193_v4  ;;  %v380_v7 = vpop.f32.mrb[1].mxu0 }
  0xe9   : > { %v272_v8 = vmax.f32 %v269_v6, 0.0 }
  0xeb   : > { %275 = vperm.xlu0 %408, %v272_v8  }
 0x16a   : > { %v276_v9 = vpop.permute.xlu0 %275 }
 0x16b   : > { %278 = vst [vmem:[%s189_s27] sm:$0xff] %v276_v9  ;;  %279 = vst [vmem:[%s189_s27 + $0x8] sm:$0xff] %v276_v9 }
 0x16c PF: > { %s13_s14 = sadd.s32 1, %s431_s14   ;;  %s499_s12 = smov %s427_s13 }
 0x16d   : > { %p10_p5 = scmp.ge.s32.totalorder %s13_s14, 4   ;;  %s500_s13 = smov %s502_s15 }
 0x16f   :  { %12 = sbr.rel (!%p10_p5) target bundleno = 2 (0x2), region = 62 }

</bundles_post_ra>
